<compile_context>
chip_gen: v5e
topology: v5e:2x2
jax: 0.10.0
libtpu: 0.0.40
codegen_flags: <defaults>
</compile_context>

<pallas_src>
import functools

import jax
import jax.numpy as jnp
from jax import lax
from jax.experimental import pallas as pl
from jax.experimental.pallas import tpu as pltpu


def _adv_kernel(data_ref, vx_ref, vy_ref, adv_ref, *, H, W):
    """One block: (C_BLK, H*W); each row is one (b, var) channel, flattened."""
    x = data_ref[...]
    vx = vx_ref[...]
    vy = vy_ref[...]
    M = x.shape[-1]                      # H * W (static)

    # Hoisted index masks: one iota, reused by all four gradients.
    flat = lax.broadcasted_iota(jnp.int32, x.shape, 1)
    w_idx = flat % W
    first_w = w_idx == 0
    last_w = w_idx == (W - 1)
    first_h = flat < W
    last_h = flat >= (H - 1) * W

    def grad(t, shift, first_mask, last_mask):
        # torch.gradient (unit spacing): central difference in the interior,
        # one-sided difference at the edges.  pltpu.roll is circular and needs
        # non-negative shifts, so t[i + shift] is a roll by M - shift.  The
        # wrapped (cross-row / cross-channel) values only land on first/last
        # positions, where the one-sided formulas below are selected instead.
        fwd = pltpu.roll(t, shift=M - shift, axis=1)   # t[i + shift]
        bwd = pltpu.roll(t, shift=shift, axis=1)       # t[i - shift]
        d_fwd = fwd - t
        d_bwd = t - bwd
        central = 0.5 * (d_fwd + d_bwd)
        return jnp.where(first_mask, d_fwd,
                         jnp.where(last_mask, d_bwd, central))

    u_x = grad(x, 1, first_w, last_w)        # gradient along W (torch dim=3)
    u_y = grad(x, W, first_h, last_h)        # gradient along H (torch dim=2)
    dvx_dx = grad(vx, 1, first_w, last_w)
    dvy_dy = grad(vy, W, first_h, last_h)

    adv_ref[...] = vx * u_x + vy * u_y + x * (dvy_dy + dvx_dx)


def _pick_rows_per_block(N, M, itemsize, target_bytes=2 * 1024 * 1024):
    """Channels (rows) per block; keeps the block layout-legal on TPU."""
    max_rows = max(1, target_bytes // (M * itemsize))
    if N <= max_rows:
        return N                     # full-extent second-to-last dim: always legal
    c = (max_rows // 8) * 8          # multiples of 8 keep sublane tiling legal
    if c == 0:
        return min(8, N)
    for d in range(c, 7, -8):        # prefer an exact divisor (no padded tail)
        if N % d == 0:
            return d
    return c                         # padded tail block is safe: rows independent


def optim_velocity_forward(data, v_x, v_y, *, target_block_bytes=2 * 1024 * 1024):
    """Pallas implementation of OptimVelocity.forward.

    data, v_x, v_y: (bs, num_vars, H, W) float32.
    Returns (adv, v_x, v_y) exactly like the PyTorch module.
    Note: like the kernel math above, this assumes H >= 2 and W >= 2
    (torch.gradient requires dim size >= 2 as well).
    """
    bs, num_vars, H, W = data.shape
    N = bs * num_vars
    M = H * W

    # Metadata-only reshapes (merging contiguous dims): no HBM traffic.
    d2 = data.reshape(N, M)
    vx2 = v_x.reshape(N, M)
    vy2 = v_y.reshape(N, M)

    c_blk = _pick_rows_per_block(N, M, jnp.dtype(data.dtype).itemsize,
                                 target_block_bytes)
    grid = (pl.cdiv(N, c_blk),)
    spec = pl.BlockSpec((c_blk, M), lambda i: (i, 0))

    adv2 = pl.pallas_call(
        functools.partial(_adv_kernel, H=H, W=W),
        out_shape=jax.ShapeDtypeStruct((N, M), data.dtype),
        grid_spec=pltpu.PrefetchScalarGridSpec(
            num_scalar_prefetch=0,
            grid=grid,
            in_specs=[spec, spec, spec],
            out_specs=spec,
        ),
        compiler_params=pltpu.CompilerParams(
            dimension_semantics=("parallel",),      # megacore sharding on v7x
            vmem_limit_bytes=48 * 1024 * 1024,      # fits 8 x ~2 MiB buffers on all gens
        ),
    )(d2, vx2, vy2)

    return adv2.reshape(bs, num_vars, H, W), v_x, v_y


def _reference_forward(data, v_x, v_y):
    """Pure-JAX reference mirroring torch.gradient semantics (for checking)."""
    def grad(x, axis):
        n = x.shape[axis]
        fwd = jnp.roll(x, -1, axis)
        bwd = jnp.roll(x, 1, axis)
        central = (fwd - bwd) * 0.5
        first = fwd - x
        last = x - bwd
        idx = lax.broadcasted_iota(jnp.int32, x.shape, axis)
        return jnp.where(idx == 0, first, jnp.where(idx == n - 1, last, central))

    u_y = grad(data, 2)
    u_x = grad(data, 3)
    adv = v_x * u_x + v_y * u_y + data * (grad(v_y, 2) + grad(v_x, 3))
    return adv


if __name__ == "__main__":
    bs, num_vars, H, W = 2, 4, 16, 16

    key = jax.random.PRNGKey(0)
    k_data, k_vx, k_vy = jax.random.split(key, 3)

    # Deterministic "parameters" (torch.randn equivalents) and input data.
    data = jax.random.normal(k_data, (bs, num_vars, H, W), dtype=jnp.float32)
    v_x = jax.random.normal(k_vx, (bs, num_vars, H, W), dtype=jnp.float32)
    v_y = jax.random.normal(k_vy, (bs, num_vars, H, W), dtype=jnp.float32)

    adv, out_vx, out_vy = optim_velocity_forward(data, v_x, v_y)
    adv = jax.block_until_ready(adv)

    # Sanity check against pure-JAX reference.
    ref = _reference_forward(data, v_x, v_y)
    assert adv.shape == (bs, num_vars, H, W)
    assert jnp.allclose(adv, ref, atol=1e-5, rtol=1e-5)
    assert jnp.array_equal(out_vx, v_x) and jnp.array_equal(out_vy, v_y)

    print("KERNEL_OK")
</pallas_src>

<mosaic_0001>
module attributes {stable_mosaic.version = 11 : i64} {
  func.func @_adv_kernel(%arg0: i32, %arg1: memref<8x256xf32, #tpu.memory_space<vmem>>, %arg2: memref<8x256xf32, #tpu.memory_space<vmem>>, %arg3: memref<8x256xf32, #tpu.memory_space<vmem>>, %arg4: memref<8x256xf32, #tpu.memory_space<vmem>>) attributes {dimension_semantics = [#tpu.dimension_semantics<parallel>], iteration_bounds = array<i64: 1>, scalar_prefetch = 0 : i64, scratch_operands = 0 : i64, tpu.core_type = #tpu.core_type<tc>, window_params = [{transform_indices = @transform_0, window_bounds = array<i64: 8, 256>}, {transform_indices = @transform_1, window_bounds = array<i64: 8, 256>}, {transform_indices = @transform_2, window_bounds = array<i64: 8, 256>}, {transform_indices = @transform_3, window_bounds = array<i64: 8, 256>}]} {
    %c0 = arith.constant 0 : index
    %c0_0 = arith.constant 0 : index
    %0 = vector.load %arg1[%c0, %c0_0] : memref<8x256xf32, #tpu.memory_space<vmem>>, vector<8x256xf32>
    %c0_1 = arith.constant 0 : index
    %c0_2 = arith.constant 0 : index
    %1 = vector.load %arg2[%c0_1, %c0_2] : memref<8x256xf32, #tpu.memory_space<vmem>>, vector<8x256xf32>
    %c0_3 = arith.constant 0 : index
    %c0_4 = arith.constant 0 : index
    %2 = vector.load %arg3[%c0_3, %c0_4] : memref<8x256xf32, #tpu.memory_space<vmem>>, vector<8x256xf32>
    %3 = tpu.iota {dimensions = array<i32: 1>} : vector<8x256xi32>
    %c16_i32 = arith.constant 16 : i32
    %c0_i32 = arith.constant 0 : i32
    %4 = arith.cmpi eq, %c16_i32, %c0_i32 : i32
    %c1_i32 = arith.constant 1 : i32
    %5 = arith.select %4, %c1_i32, %c16_i32 : i32
    %6 = vector.broadcast %5 : i32 to vector<8x256xi32>
    %7 = arith.remsi %3, %6 : vector<8x256xi32>
    %c0_i32_5 = arith.constant 0 : i32
    %8 = vector.broadcast %c0_i32_5 : i32 to vector<8x256xi32>
    %9 = arith.cmpi ne, %7, %8 : vector<8x256xi32>
    %c0_i32_6 = arith.constant 0 : i32
    %10 = vector.broadcast %c0_i32_6 : i32 to vector<8x256xi32>
    %11 = arith.cmpi slt, %7, %10 : vector<8x256xi32>
    %c0_i32_7 = arith.constant 0 : i32
    %12 = arith.cmpi slt, %5, %c0_i32_7 : i32
    %13 = vector.broadcast %12 : i1 to vector<8x256xi1>
    %14 = vector.broadcast %13 : vector<8x256xi1> to vector<8x256xi1>
    %15 = arith.xori %11, %14 : vector<8x256xi1>
    %16 = arith.andi %15, %9 : vector<8x256xi1>
    %17 = vector.broadcast %5 : i32 to vector<8x256xi32>
    %18 = arith.addi %7, %17 : vector<8x256xi32>
    %19 = arith.select %16, %18, %7 : vector<8x256xi1>, vector<8x256xi32>
    %c0_i32_8 = arith.constant 0 : i32
    %20 = vector.broadcast %c0_i32_8 : i32 to vector<8x256xi32>
    %21 = arith.cmpi eq, %19, %20 : vector<8x256xi32>
    %c15_i32 = arith.constant 15 : i32
    %22 = vector.broadcast %c15_i32 : i32 to vector<8x256xi32>
    %23 = arith.cmpi eq, %19, %22 : vector<8x256xi32>
    %c16_i32_9 = arith.constant 16 : i32
    %24 = vector.broadcast %c16_i32_9 : i32 to vector<8x256xi32>
    %25 = arith.cmpi slt, %3, %24 : vector<8x256xi32>
    %c240_i32 = arith.constant 240 : i32
    %26 = vector.broadcast %c240_i32 : i32 to vector<8x256xi32>
    %27 = arith.cmpi sge, %3, %26 : vector<8x256xi32>
    %c255_i32 = arith.constant 255 : i32
    %28 = tpu.dynamic_rotate %0 by %c255_i32 dim 1 : vector<8x256xf32>, i32 -> vector<8x256xf32>
    %c1_i32_10 = arith.constant 1 : i32
    %29 = tpu.dynamic_rotate %0 by %c1_i32_10 dim 1 : vector<8x256xf32>, i32 -> vector<8x256xf32>
    %30 = arith.subf %28, %0 : vector<8x256xf32>
    %31 = arith.subf %0, %29 : vector<8x256xf32>
    %32 = arith.addf %30, %31 : vector<8x256xf32>
    %cst = arith.constant 5.000000e-01 : f32
    %33 = vector.broadcast %cst : f32 to vector<8x256xf32>
    %34 = arith.mulf %33, %32 : vector<8x256xf32>
    %35 = arith.select %23, %31, %34 : vector<8x256xi1>, vector<8x256xf32>
    %36 = arith.select %21, %30, %35 : vector<8x256xi1>, vector<8x256xf32>
    %c240_i32_11 = arith.constant 240 : i32
    %37 = tpu.dynamic_rotate %0 by %c240_i32_11 dim 1 : vector<8x256xf32>, i32 -> vector<8x256xf32>
    %c16_i32_12 = arith.constant 16 : i32
    %38 = tpu.dynamic_rotate %0 by %c16_i32_12 dim 1 : vector<8x256xf32>, i32 -> vector<8x256xf32>
    %39 = arith.subf %37, %0 : vector<8x256xf32>
    %40 = arith.subf %0, %38 : vector<8x256xf32>
    %41 = arith.addf %39, %40 : vector<8x256xf32>
    %cst_13 = arith.constant 5.000000e-01 : f32
    %42 = vector.broadcast %cst_13 : f32 to vector<8x256xf32>
    %43 = arith.mulf %42, %41 : vector<8x256xf32>
    %44 = arith.select %27, %40, %43 : vector<8x256xi1>, vector<8x256xf32>
    %45 = arith.select %25, %39, %44 : vector<8x256xi1>, vector<8x256xf32>
    %c255_i32_14 = arith.constant 255 : i32
    %46 = tpu.dynamic_rotate %1 by %c255_i32_14 dim 1 : vector<8x256xf32>, i32 -> vector<8x256xf32>
    %c1_i32_15 = arith.constant 1 : i32
    %47 = tpu.dynamic_rotate %1 by %c1_i32_15 dim 1 : vector<8x256xf32>, i32 -> vector<8x256xf32>
    %48 = arith.subf %46, %1 : vector<8x256xf32>
    %49 = arith.subf %1, %47 : vector<8x256xf32>
    %50 = arith.addf %48, %49 : vector<8x256xf32>
    %cst_16 = arith.constant 5.000000e-01 : f32
    %51 = vector.broadcast %cst_16 : f32 to vector<8x256xf32>
    %52 = arith.mulf %51, %50 : vector<8x256xf32>
    %53 = arith.select %23, %49, %52 : vector<8x256xi1>, vector<8x256xf32>
    %54 = arith.select %21, %48, %53 : vector<8x256xi1>, vector<8x256xf32>
    %c240_i32_17 = arith.constant 240 : i32
    %55 = tpu.dynamic_rotate %2 by %c240_i32_17 dim 1 : vector<8x256xf32>, i32 -> vector<8x256xf32>
    %c16_i32_18 = arith.constant 16 : i32
    %56 = tpu.dynamic_rotate %2 by %c16_i32_18 dim 1 : vector<8x256xf32>, i32 -> vector<8x256xf32>
    %57 = arith.subf %55, %2 : vector<8x256xf32>
    %58 = arith.subf %2, %56 : vector<8x256xf32>
    %59 = arith.addf %57, %58 : vector<8x256xf32>
    %cst_19 = arith.constant 5.000000e-01 : f32
    %60 = vector.broadcast %cst_19 : f32 to vector<8x256xf32>
    %61 = arith.mulf %60, %59 : vector<8x256xf32>
    %62 = arith.select %27, %58, %61 : vector<8x256xi1>, vector<8x256xf32>
    %63 = arith.select %25, %57, %62 : vector<8x256xi1>, vector<8x256xf32>
    %64 = arith.mulf %1, %36 : vector<8x256xf32>
    %65 = arith.mulf %2, %45 : vector<8x256xf32>
    %66 = arith.addf %64, %65 : vector<8x256xf32>
    %67 = arith.addf %63, %54 : vector<8x256xf32>
    %68 = arith.mulf %0, %67 : vector<8x256xf32>
    %69 = arith.addf %66, %68 : vector<8x256xf32>
    %c0_20 = arith.constant 0 : index
    %c0_21 = arith.constant 0 : index
    %70 = vector.load %arg4[%c0_20, %c0_21] : memref<8x256xf32, #tpu.memory_space<vmem>>, vector<8x256xf32>
    tpu.vector_store %arg4[%c0_20, %c0_21], %69 {strides = array<i32>} : memref<8x256xf32, #tpu.memory_space<vmem>>, vector<8x256xf32>,
    return
  }
  func.func @transform_0(%arg0: i32) -> (i32, i32) {
    %c0_i32 = arith.constant 0 : i32
    %c0_i32_0 = arith.constant 0 : i32
    return %arg0, %c0_i32 : i32, i32
  }
  func.func @transform_1(%arg0: i32) -> (i32, i32) {
    %c0_i32 = arith.constant 0 : i32
    %c0_i32_0 = arith.constant 0 : i32
    return %arg0, %c0_i32 : i32, i32
  }
  func.func @transform_2(%arg0: i32) -> (i32, i32) {
    %c0_i32 = arith.constant 0 : i32
    %c0_i32_0 = arith.constant 0 : i32
    return %arg0, %c0_i32 : i32, i32
  }
  func.func @transform_3(%arg0: i32) -> (i32, i32) {
    %c0_i32 = arith.constant 0 : i32
    %c0_i32_0 = arith.constant 0 : i32
    return %arg0, %c0_i32 : i32, i32
  }
}

</mosaic_0001>

<bundles_post_ra>
// kernel: tpu_custom_call.1
= control target key start
LH: loop header
LB: loop body
LE: loop exit
PB: predicated region body
PF: predicated region fallthrough
CT: control target
= control target key end

     0   :  { %8 = vsyncpa [#allocation3], 0  ;;  %s512_s0 = inlined_call_operand.hbm [shape: f32[8,256], index: 0, kind: input, shape index: {}]   ;;  %s513_s1 = inlined_call_operand.hbm [shape: f32[8,256], index: 1, kind: input, shape index: {}]   ;;  %s514_s2 = inlined_call_operand.hbm [shape: f32[8,256], index: 2, kind: input, shape index: {}]   ;;  %s515_s3 = inlined_call_operand.hbm [shape: f32[8,256], index: 3, kind: output, shape index: {}]  }
   0x1   :  { %9 = vsyncpa [#allocation6], 0  ;;  %s27_s14 = sshll.u32 %s513_s1, 4  ;;  %s28_s14 = int_to_ptr.hbm [resolvable:$true] %s27_s14 }
   0x2   :  { %10 = vsyncpa [#allocation4], 0  ;;  %s338_s15 = smov [#allocation5]   ;;  %s16_s19 = sshll.u32 %s512_s0, 4  ;;  %s17_s19 = int_to_ptr.hbm [resolvable:$true] %s16_s19 }
   0x3   :  { %s29_s16 = sshll.u32 %s338_s15, 4  ;;  %s339_s20 = smov [#allocation2]   ;;  %s30_s16 = int_to_ptr.vmem [resolvable:$true] %s29_s16 }
   0x4   :  { %32 = dma.hbm_to_vmem [thread:$0]  %s28_s14, 256, %s30_s16, [#allocation6]  }
   0x5   :  { %s18_s21 = sshll.u32 %s339_s20, 4  ;;  %s38_s24 = sshll.u32 %s514_s2, 4  ;;  %s19_s21 = int_to_ptr.vmem [resolvable:$true] %s18_s21  ;;  %s39_s24 = int_to_ptr.hbm [resolvable:$true] %s38_s24 }
   0x6   :  { %21 = dma.hbm_to_vmem [thread:$0]  %s17_s19, 256, %s19_s21, [#allocation3]  }
   0x7   :  { %s340_s1 = smov [#allocation7]  }
   0x8   :  { %s40_s25 = sshll.u32 %s340_s1, 4  ;;  %s41_s25 = int_to_ptr.vmem [resolvable:$true] %s40_s25 }
   0x9   :  { %43 = dma.hbm_to_vmem [thread:$0]  %s39_s24, 256, %s41_s25, [#allocation6]  }
   0xa   :  { %332 = dma.done.wait [#allocation3], 256  }
   0xb   :  { %333 = vsyncadd [#allocation3], 4294967040 }
   0xc   :  { %334 = dma.done.wait [#allocation6], 512  }
   0xd   :  { %335 = vsyncadd [#allocation6], 4294966784  ;;  %v375_v0 = vld [vmem:[#allocation2] sm:$0xff]  ;;  %s341_s0 = smov 1   ;;  %s342_s26 = smov 127   ;;  %v379_v1 = vld [vmem:[#allocation5] sm:$0xff]  ;;  %v62_v15 = vlaneseq }
   0xe   :  { %104 = vrot.lane.b32.xlu1 %v375_v0, %s341_s0  ;;  %97 = vrot.lane.b32.xlu0 %v375_v0, %s342_s26  ;;  %v382_v2 = vld [vmem:[#allocation2 + $0x8] sm:$0xff]  ;;  %v386_v3 = vld [vmem:[#allocation5 + $0x8] sm:$0xff]  ;;  %s343_s2 = smov 112   ;;  %s344_s27 = smov 16   ;;  %v397_v5 = vld [vmem:[#allocation7] sm:$0xff] }
   0xf   :  { %148 = vrot.lane.b32.xlu2 %v379_v1, %s342_s26  ;;  %v395_v4 = vld [vmem:[#allocation7 + $0x8] sm:$0xff]  ;;  %v403_v16 = vand.u32 127, %v62_v15  ;;  %s345_s28 = smov [#allocation8]   ;;  %s217_s5 = sshll.u32 %s515_s3, 4  ;;  %s218_s5 = int_to_ptr.hbm [resolvable:$true] %s217_s5 }
  0x10   :  { %s215_s29 = sshll.u32 %s345_s28, 4  ;;  %s216_s29 = int_to_ptr.vmem [resolvable:$true] %s215_s29 }
  0x11   :  { %vm101_vm0 = vcmp.lt.s32.totalorder %v403_v16, 127  ;;  %vm108_vm1 = vcmp.lt.s32.totalorder %v403_v16, 1  ;;  %vm93_vm2 = vcmp.lt.s32.totalorder %v403_v16, 16  ;;  %vm127_vm3 = vcmp.lt.s32.totalorder %v403_v16, 112 }
  0x12   :  { %v410_v20 = vadd.s32 128, %v403_v16  ;;  %v69_v44 = vand.u32 15, %v403_v16 }
  0x14   :  { %v76_v49 = vand.u32 15, %v410_v20  ;;  %vm450_vm4 = vcmp.eq.s32.totalorder %v69_v44, 15  ;;  %vm96_vm6 = vcmp.ge.s32.totalorder %v410_v20, 240  ;;  %vm471_vm7 = vcmp.eq.s32.totalorder %v69_v44, 0 }
  0x16   :  { %106 = vrot.lane.b32.xlu1 %v382_v2, %s341_s0  ;;  %99 = vrot.lane.b32.xlu0 %v382_v2, %s342_s26  ;;  %vm458_vm5 = vcmp.eq.s32.totalorder %v76_v49, 15  ;;  %vm475_vm8 = vcmp.eq.s32.totalorder %v76_v49, 0 }
  0x17   :  { %150 = vrot.lane.b32.xlu2 %v386_v3, %s342_s26 }
  0x1e   :  { %156 = vrot.lane.b32.xlu1 %v386_v3, %s341_s0  ;;  %154 = vrot.lane.b32.xlu0 %v379_v1, %s341_s0 }
  0x1f   :  { %123 = vrot.lane.b32.xlu2 %v375_v0, %s343_s2 }
  0x26   :  { %130 = vrot.lane.b32.xlu1 %v375_v0, %s344_s27  ;;  %125 = vrot.lane.b32.xlu0 %v382_v2, %s343_s2 }
  0x27   :  { %132 = vrot.lane.b32.xlu2 %v382_v2, %s344_s27 }
  0x2e   :  { %174 = vrot.lane.b32.xlu1 %v395_v4, %s343_s2  ;;  %172 = vrot.lane.b32.xlu0 %v397_v5, %s343_s2 }
  0x2f   :  { %178 = vrot.lane.b32.xlu2 %v397_v5, %s344_s27 }
  0x36   :  { %180 = vrot.lane.b32.xlu0 %v395_v4, %s344_s27 }
  0x69   :  { %v149_v6 = vpop.permute.xlu2 %148 }
  0x71   :  { %v151_v9 = vpop.permute.xlu2 %150 }
  0x72   :  { %v152_v29 = vsel %vm101_vm0, %v149_v6, %v151_v9  ;;  %v153_v30 = vsel %vm101_vm0, %v151_v9, %v149_v6 }
  0x73   :  { %v160_v45 = vsub.f32 %v152_v29, %v379_v1  ;;  %v161_v46 = vsub.f32 %v153_v30, %v386_v3 }
  0x79   :  { %v124_v12 = vpop.permute.xlu2 %123 }
  0x80   :  { %v105_v7 = vpop.permute.xlu1 %104  ;;  %v98_v8 = vpop.permute.xlu0 %97 }
  0x81   :  { %v133_v18 = vpop.permute.xlu2 %132 }
  0x88   :  { %v107_v10 = vpop.permute.xlu1 %106  ;;  %v100_v11 = vpop.permute.xlu0 %99 }
  0x89   :  { %v109_v21 = vsel %vm108_vm1, %v105_v7, %v107_v10  ;;  %v110_v22 = vsel %vm108_vm1, %v107_v10, %v105_v7  ;;  %v102_v23 = vsel %vm101_vm0, %v98_v8, %v100_v11  ;;  %v103_v24 = vsel %vm101_vm0, %v100_v11, %v98_v8  ;;  %v179_v56 = vpop.permute.xlu2 %178 }
  0x8a   :  { %v113_v33 = vsub.f32 %v375_v0, %v110_v22  ;;  %v114_v34 = vsub.f32 %v382_v2, %v109_v21  ;;  %v111_v35 = vsub.f32 %v102_v23, %v375_v0  ;;  %v112_v36 = vsub.f32 %v103_v24, %v382_v2 }
  0x8c   :  { %v115_v47 = vadd.f32 %v113_v33, %v111_v35  ;;  %v116_v48 = vadd.f32 %v114_v34, %v112_v36 }
  0x8e   :  { %v117_v57 = vmul.f32 0.5, %v115_v47  ;;  %v118_v58 = vmul.f32 0.5, %v116_v48 }
  0x90   :  { %v157_v13 = vpop.permute.xlu1 %156  ;;  %v155_v14 = vpop.permute.xlu0 %154 }
  0x91   :  { %v158_v31 = vsel %vm108_vm1, %v155_v14, %v157_v13  ;;  %v159_v32 = vsel %vm108_vm1, %v157_v13, %v155_v14 }
  0x92   :  { %v162_v42 = vsub.f32 %v379_v1, %v159_v32  ;;  %v163_v43 = vsub.f32 %v386_v3, %v158_v31 }
  0x94   :  { %v164_v53 = vadd.f32 %v162_v42, %v160_v45  ;;  %v165_v54 = vadd.f32 %v163_v43, %v161_v46 }
  0x96   :  { %v166_v7 = vmul.f32 0.5, %v164_v53  ;;  %v167_v8 = vmul.f32 0.5, %v165_v54 }
  0x98   :  { %v126_v17 = vpop.permute.xlu0 %125  ;;  %v131_v19 = vpop.permute.xlu1 %130 }
  0x99   :  { %v134_v25 = vsel %vm93_vm2, %v131_v19, %v133_v18  ;;  %v135_v26 = vsel %vm93_vm2, %v133_v18, %v131_v19  ;;  %v128_v27 = vsel %vm127_vm3, %v124_v12, %v126_v17  ;;  %v129_v28 = vsel %vm127_vm3, %v126_v17, %v124_v12 }
  0x9a   :  { %v138_v37 = vsub.f32 %v375_v0, %v135_v26  ;;  %v139_v38 = vsub.f32 %v382_v2, %v134_v25  ;;  %v136_v39 = vsub.f32 %v128_v27, %v375_v0  ;;  %v137_v40 = vsub.f32 %v129_v28, %v382_v2 }
  0x9b   :  { %v119_v18 = vsel %vm450_vm4, %v113_v33, %v117_v57  ;;  %v120_v19 = vsel %vm458_vm5, %v114_v34, %v118_v58  ;;  %v168_v25 = vsel %vm450_vm4, %v162_v42, %v166_v7  ;;  %v169_v26 = vsel %vm458_vm5, %v163_v43, %v167_v8 }
  0x9c   :  { %v140_v50 = vadd.f32 %v138_v37, %v136_v39  ;;  %v141_v51 = vadd.f32 %v139_v38, %v137_v40  ;;  %v121_v27 = vsel %vm471_vm7, %v111_v35, %v119_v18  ;;  %v122_v28 = vsel %vm475_vm8, %v112_v36, %v120_v19 }
  0x9d   :  { %v170_v33 = vsel %vm471_vm7, %v160_v45, %v168_v25  ;;  %v171_v34 = vsel %vm475_vm8, %v161_v46, %v169_v26  ;;  %v196_v36 = vmul.f32 %v121_v27, %v379_v1 }
  0x9e   :  { %v142_v62 = vmul.f32 0.5, %v140_v50  ;;  %v143_v63 = vmul.f32 0.5, %v141_v51 }
  0xa0   :  { %v173_v41 = vpop.permute.xlu0 %172  ;;  %v175_v52 = vpop.permute.xlu1 %174  ;;  %v146_v21 = vsel %vm93_vm2, %v136_v39, %v142_v62  ;;  %v145_v22 = vsel %vm96_vm6, %v139_v38, %v143_v63  ;;  %v197_v38 = vmul.f32 %v122_v28, %v386_v3 }
  0xa1   :  { %v176_v59 = vsel %vm127_vm3, %v173_v41, %v175_v52  ;;  %v177_v60 = vsel %vm127_vm3, %v175_v52, %v173_v41  ;;  %v198_v31 = vmul.f32 %v146_v21, %v397_v5  ;;  %v199_v32 = vmul.f32 %v145_v22, %v395_v4 }
  0xa2   :  { %v184_v11 = vsub.f32 %v176_v59, %v397_v5  ;;  %v185_v12 = vsub.f32 %v177_v60, %v395_v4 }
  0xa3   :  { %v200_v40 = vadd.f32 %v198_v31, %v196_v36 }
  0xa8   :  { %v181_v6 = vpop.permute.xlu0 %180 }
  0xa9   :  { %v182_v9 = vsel %vm93_vm2, %v179_v56, %v181_v6  ;;  %v183_v10 = vsel %vm93_vm2, %v181_v6, %v179_v56 }
  0xaa   :  { %v186_v13 = vsub.f32 %v397_v5, %v183_v10  ;;  %v187_v14 = vsub.f32 %v395_v4, %v182_v9  ;;  %v201_v4 = vadd.f32 %v199_v32, %v197_v38 }
  0xac   :  { %v188_v23 = vadd.f32 %v186_v13, %v184_v11  ;;  %v189_v24 = vadd.f32 %v187_v14, %v185_v12 }
  0xae   :  { %v190_v29 = vmul.f32 0.5, %v188_v23  ;;  %v191_v30 = vmul.f32 0.5, %v189_v24 }
  0xb0   :  { %v193_v37 = vsel %vm96_vm6, %v187_v14, %v191_v30  ;;  %v194_v35 = vsel %vm93_vm2, %v184_v11, %v190_v29 }
  0xb1   :  { %v202_v39 = vadd.f32 %v194_v35, %v170_v33  ;;  %v203_v5 = vadd.f32 %v193_v37, %v171_v34 }
  0xb3   :  { %v204_v41 = vmul.f32 %v202_v39, %v375_v0  ;;  %v205_v42 = vmul.f32 %v203_v5, %v382_v2 }
  0xb5   :  { %v206_v16 = vadd.f32 %v204_v41, %v200_v40  ;;  %v207_v20 = vadd.f32 %v205_v42, %v201_v4 }
  0xb7   :  { %208 = vst [vmem:[#allocation8] sm:$0xff] %v206_v16 }
  0xb8   :  { %209 = vst [vmem:[#allocation8 + $0x8] sm:$0xff] %v207_v20 }
  0xb9   :  { %220 = dma.vmem_to_hbm [thread:$0]  %s216_s29, 256, %s218_s5, [#allocation4]  }
  0xba   :  { %336 = dma.done.wait [#allocation4], 256  }
  0xbb   :  { %337 = vsyncadd [#allocation4], 4294967040 }
  0xbc   :  { %225 = vsyncpa [#allocation3], 1 }
  0xbd   :  { %226 = vsyncpa [#allocation6], 1 }
  0xbe   :  { %227 = vsyncpa [#allocation4], 1 }

</bundles_post_ra>
